<compile_context>
chip_gen: v7x
topology: tpu7x:2x2x1
jax: 0.10.0
libtpu: 0.0.40
codegen_flags: <defaults>
</compile_context>

<pallas_src>
import functools

import jax
import jax.numpy as jnp
from jax.experimental import pallas as pl
from jax.experimental.pallas import tpu as pltpu

_LANE = 128


def _gmof_kernel(x_ref, o_ref, *, rho_sq):
    # Upcast to f32 for the squaring / division, cast back on the store.
    x = x_ref[...].astype(jnp.float32)
    sq = x * x
    o_ref[...] = ((rho_sq * sq) / (sq + rho_sq)).astype(o_ref.dtype)


def _sublane_multiple(dtype) -> int:
    # Packed sublane granularity: 8 for 32-bit, 16 for bf16/fp16, 32 for 8-bit.
    itemsize = jnp.dtype(dtype).itemsize
    return 8 * max(1, 4 // itemsize)


def _run_gmof_2d(x2d: jax.Array, rho_sq: float) -> jax.Array:
    rows, cols = x2d.shape
    dtype = x2d.dtype
    itemsize = jnp.dtype(dtype).itemsize
    sublane = _sublane_multiple(dtype)

    # ~2 MiB per block: >=85% of HBM roofline for streaming, and
    # 2 blocks (in+out) x 2 buffers fits every generation's default VMEM budget.
    target_block_bytes = 2 * 1024 * 1024
    tile_rows = max(sublane,
                    (target_block_bytes // (cols * itemsize)) // sublane * sublane)

    if rows <= tile_rows:
        # Single full-array block (always a legal block shape).
        tile_rows = rows
        grid = (1,)
    else:
        # Fixed large tile; last block may be partial (Pallas masks it).
        grid = (pl.cdiv(rows, tile_rows),)

    kernel = functools.partial(_gmof_kernel, rho_sq=rho_sq)
    return pl.pallas_call(
        kernel,
        out_shape=jax.ShapeDtypeStruct((rows, cols), dtype),
        grid_spec=pltpu.PrefetchScalarGridSpec(
            num_scalar_prefetch=0,
            grid=grid,
            in_specs=[pl.BlockSpec((tile_rows, cols), lambda i: (i, 0))],
            out_specs=pl.BlockSpec((tile_rows, cols), lambda i: (i, 0)),
        ),
        compiler_params=pltpu.CompilerParams(
            dimension_semantics=("parallel",),
        ),
    )(x2d)


def gmof(residual: jax.Array, rho: float = 100.0) -> jax.Array:
    """Geman-McClure penalty, elementwise, via a Pallas TPU kernel.

    rho is a static (construction-time) constant in the PyTorch module, so it is
    baked into the kernel as a closure constant (no SMEM load needed).
    """
    orig_shape = residual.shape
    n = residual.size
    rho_sq = float(rho) ** 2

    if n == 0:
        return residual

    flat = jnp.ravel(residual)

    # Fast path (common case): element count is a multiple of 128 -> no pad /
    # slice HBM round trips, just a reshape to a lane-dense 2-D slab.  Prefer a
    # wider last dim (unmasked, wide stores / DMA descriptors).
    if n % _LANE == 0:
        cols = _LANE
        for c in (2048, 1024, 512, 256):
            if n % c == 0:
                cols = c
                break
        out2d = _run_gmof_2d(flat.reshape(n // cols, cols), rho_sq)
        return out2d.reshape(orig_shape)

    # Ragged fallback: pad up to whole sublane-aligned 128-lane rows, crop after.
    # Zero padding is benign since gmof(0) == 0 and the pad is cropped.
    # TODO(synk): handle the ragged tail in-kernel (masked store) to drop these copies.
    sublane = _sublane_multiple(residual.dtype)
    chunk = sublane * _LANE
    padded = pl.cdiv(n, chunk) * chunk
    flat = jnp.pad(flat, (0, padded - n))
    out2d = _run_gmof_2d(flat.reshape(padded // _LANE, _LANE), rho_sq)
    return out2d.reshape(-1)[:n].reshape(orig_shape)


def _gmof_ref(residual, rho=100.0):
    sq = residual.astype(jnp.float32) ** 2
    return ((rho ** 2) * sq / (sq + rho ** 2)).astype(residual.dtype)


if __name__ == "__main__":
    key = jax.random.PRNGKey(0)
    rho = 100.0

    # Small shape consistent with typical residual tensors: batch=2, channels=4,
    # spatial=16x16 (lane-aligned -> exercises the no-copy fast path).
    x = jax.random.normal(key, (2, 4, 16, 16), dtype=jnp.float32) * 50.0
    out = jax.block_until_ready(gmof(x, rho=rho))
    ref = _gmof_ref(x, rho=rho)
    assert out.shape == x.shape and out.dtype == x.dtype
    assert jnp.allclose(out, ref, atol=1e-4, rtol=1e-5), "mismatch vs reference (aligned path)"

    # Ragged shape -> exercises the padded fallback path.
    y = jax.random.normal(jax.random.PRNGKey(1), (5, 7, 3), dtype=jnp.float32) * 50.0
    out_y = jax.block_until_ready(gmof(y, rho=rho))
    ref_y = _gmof_ref(y, rho=rho)
    assert out_y.shape == y.shape and out_y.dtype == y.dtype
    assert jnp.allclose(out_y, ref_y, atol=1e-4, rtol=1e-5), "mismatch vs reference (ragged path)"

    print("KERNEL_OK")
</pallas_src>

<mosaic_0001>
module attributes {stable_mosaic.version = 11 : i64} {
  func.func @_gmof_kernel(%arg0: i32, %arg1: memref<1x2048xf32, #tpu.memory_space<vmem>>, %arg2: memref<1x2048xf32, #tpu.memory_space<vmem>>) attributes {dimension_semantics = [#tpu.dimension_semantics<parallel>], iteration_bounds = array<i64: 1>, scalar_prefetch = 0 : i64, scratch_operands = 0 : i64, tpu.core_type = #tpu.core_type<tc>, window_params = [{transform_indices = @transform_0, window_bounds = array<i64: 1, 2048>}, {transform_indices = @transform_1, window_bounds = array<i64: 1, 2048>}]} {
    %c0 = arith.constant 0 : index
    %c0_0 = arith.constant 0 : index
    %0 = vector.load %arg1[%c0, %c0_0] : memref<1x2048xf32, #tpu.memory_space<vmem>>, vector<1x2048xf32>
    %1 = arith.mulf %0, %0 : vector<1x2048xf32>
    %cst = arith.constant 1.000000e+04 : f32
    %2 = vector.broadcast %cst : f32 to vector<1x2048xf32>
    %3 = arith.mulf %2, %1 : vector<1x2048xf32>
    %cst_1 = arith.constant 1.000000e+04 : f32
    %4 = vector.broadcast %cst_1 : f32 to vector<1x2048xf32>
    %5 = arith.addf %1, %4 : vector<1x2048xf32>
    %6 = arith.divf %3, %5 : vector<1x2048xf32>
    %c0_2 = arith.constant 0 : index
    %c0_3 = arith.constant 0 : index
    %7 = vector.load %arg2[%c0_2, %c0_3] : memref<1x2048xf32, #tpu.memory_space<vmem>>, vector<1x2048xf32>
    tpu.vector_store %arg2[%c0_2, %c0_3], %6 {strides = array<i32>} : memref<1x2048xf32, #tpu.memory_space<vmem>>, vector<1x2048xf32>,
    return
  }
  func.func @transform_0(%arg0: i32) -> (i32, i32) {
    %c0_i32 = arith.constant 0 : i32
    %c0_i32_0 = arith.constant 0 : i32
    return %arg0, %c0_i32 : i32, i32
  }
  func.func @transform_1(%arg0: i32) -> (i32, i32) {
    %c0_i32 = arith.constant 0 : i32
    %c0_i32_0 = arith.constant 0 : i32
    return %arg0, %c0_i32 : i32, i32
  }
}

</mosaic_0001>

<bundles_post_ra>
// kernel: tpu_custom_call.1
= control target key start
LH: loop header
LB: loop body
LE: loop exit
PB: predicated region body
PF: predicated region fallthrough
CT: control target
= control target key end

     0   :  { %6 = vsyncpa [#allocation3], 0  ;;  %s140_s0 = inlined_call_operand.hbm [shape: f32[1,2048], index: 0, kind: input, shape index: {}]   ;;  %s141_s1 = inlined_call_operand.hbm [shape: f32[1,2048], index: 1, kind: output, shape index: {}]  }
   0x1   :  { %7 = vsyncpa [#allocation4], 0  ;;  %s104_s6 = smov [#allocation2]   ;;  %s56_s10 = scalar_lea.hbm %s140_s0, 256 }
   0x2   :  { %s14_s7 = sshll.u32 %s104_s6, 4  ;;  %p57_p0 = scmp.ne.s32.totalorder %s140_s0, %s56_s10  ;;  %s15_s7 = int_to_ptr.vmem [resolvable:$true] %s14_s7 }
   0x3   :  { %p60_p1 = scmp.lt.u32.totalorder %s56_s10, %s140_s0 }
   0x5   :  { %p62_p2 = pnand %p60_p1, %p57_p0 }
   0x7   :  { %65 = shalt.err (!%p62_p2)
}
   0x8   :  { %s66_s15 = scalar_lea.vmem %s15_s7, 256  ;;  %p71_p4 = scmp.lt.s32.totalorder %s15_s7, %s15_s7 }
   0x9   :  { %p67_p3 = scmp.ne.s32.totalorder %s15_s7, %s66_s15  ;;  %p72_p5 = scmp.lt.s32.totalorder %s66_s15, %s66_s15 }
   0xb   :  { %p73_p6 = por %p72_p5, %p71_p4 }
   0xd   :  { %p74_p7 = pnand %p73_p6, %p67_p3 }
   0xf   :  { %77 = shalt.err (!%p74_p7)
}
  0x10   :  { %17 = dma.hbm_to_vmem [thread:$0]  %s140_s0, 256, %s15_s7, [#allocation3]  }
  0x11   :  { %100 = dma.done.wait [#allocation3], 256  }
  0x12   :  { %101 = vsyncadd [#allocation3], 4294967040  ;;  %v21_v0 = vld [vmem:[#allocation2] sm:$0xff]  ;;  %v22_v1 = vld [vmem:[#allocation2 + $0x8] sm:$0xff]  ;;  %s105_s18 = smov [#allocation5]  }
  0x13   :  { %v23_v2 = vmul.f32 %v21_v0, %v21_v0  ;;  %v24_v3 = vmul.f32 %v22_v1, %v22_v1  ;;  %s41_s19 = sshll.u32 %s105_s18, 4  ;;  %s42_s19 = int_to_ptr.vmem [resolvable:$true] %s41_s19 }
  0x14   :  { %s78_s0 = scalar_lea.vmem %s42_s19, 256  ;;  %p83_p9 = scmp.lt.s32.totalorder %s42_s19, %s42_s19 }
  0x15   :  { %v27_v4 = vadd.f32 10000.0, %v23_v2  ;;  %v28_v5 = vadd.f32 10000.0, %v24_v3  ;;  %v25_v6 = vmul.f32 10000.0, %v23_v2  ;;  %v26_v7 = vmul.f32 10000.0, %v24_v3  ;;  %p79_p8 = scmp.ne.s32.totalorder %s42_s19, %s78_s0  ;;  %p84_p10 = scmp.lt.s32.totalorder %s78_s0, %s78_s0 }
  0x17   :  { %52 = vrcp.f32 %v27_v4  ;;  %p85_p11 = por %p84_p10, %p83_p9 }
  0x18   :  { %54 = vrcp.f32 %v28_v5 }
  0x19   :  { %p86_p12 = pnand %p85_p11, %p79_p8 }
  0x21   :  { %v53_v8 = vpop.eup %52 }
  0x22   :  { %v55_v9 = vpop.eup %54  ;;  %v30_v10 = vmul.f32 %v53_v8, %v25_v6 }
  0x23   :  { %v32_v11 = vmul.f32 %v55_v9, %v26_v7 }
  0x24   :  { %33 = vst [vmem:[#allocation5] sm:$0xff] %v30_v10 }
  0x25   :  { %34 = vst [vmem:[#allocation5 + $0x8] sm:$0xff] %v32_v11 }
  0x26   :  { %89 = shalt.err (!%p86_p12)
}
  0x27   :  { %s90_s22 = scalar_lea.hbm %s141_s1, 256 }
  0x28   :  { %p91_p13 = scmp.ne.s32.totalorder %s141_s1, %s90_s22  ;;  %p94_p0 = scmp.lt.u32.totalorder %s90_s22, %s141_s1 }
  0x2a   :  { %p96_p1 = pnand %p94_p0, %p91_p13 }
  0x2c   :  { %99 = shalt.err (!%p96_p1)
}
  0x2d   :  { %44 = dma.vmem_to_hbm [thread:$0]  %s42_s19, 256, %s141_s1, [#allocation4]  }
  0x2e   :  { %102 = dma.done.wait [#allocation4], 256  }
  0x2f   :  { %103 = vsyncadd [#allocation4], 4294967040 }
  0x30   :  { %48 = vsyncpa [#allocation3], 1 }
  0x31   :  { %49 = vsyncpa [#allocation4], 1 }

</bundles_post_ra>
